<compile_context>
chip_gen: v6e
topology: v6e:2x2x1
jax: 0.10.0
libtpu: 0.0.40
codegen_flags: <defaults>
</compile_context>

<pallas_src>
import jax
import jax.numpy as jnp
from jax.experimental import pallas as pl
from jax.experimental.pallas import tpu as pltpu

_SUBLANE = 8      # f32 sublane granularity for the batch tile
_MAX_TM = 256     # cap the batch tile (MXU height on v6e/v7x)


def _round_up(n, m):
    return ((n + m - 1) // m) * m


def _fused_jae_kernel(x_ref,
                      ew1_ref, eb1_ref, ew2_ref, eb2_ref,
                      dw1_ref, db1_ref, dw2_ref, db2_ref,
                      rep_ref, xhat_ref):
    """All four Linear+activation layers fused; intermediates never leave VMEM."""
    x = x_ref[...]

    # encoder layer 1: ReLU(x @ W1 + b1)
    h = jnp.dot(x, ew1_ref[...], preferred_element_type=jnp.float32) + eb1_ref[...]
    h = jnp.maximum(h, 0.0)

    # encoder layer 2: rep = ReLU(h @ W2 + b2)
    rep = jnp.dot(h, ew2_ref[...], preferred_element_type=jnp.float32) + eb2_ref[...]
    rep = jnp.maximum(rep, 0.0)
    rep_ref[...] = rep.astype(rep_ref.dtype)

    # decoder layer 1: ReLU(rep @ W3 + b3)   (rep stays in vregs, no HBM bounce)
    h2 = jnp.dot(rep, dw1_ref[...], preferred_element_type=jnp.float32) + db1_ref[...]
    h2 = jnp.maximum(h2, 0.0)

    # decoder layer 2: x_hat = sigmoid(h2 @ W4 + b4)   (sigmoid -> EUP slot)
    y = jnp.dot(h2, dw2_ref[...], preferred_element_type=jnp.float32) + db2_ref[...]
    xhat_ref[...] = jax.nn.sigmoid(y).astype(xhat_ref.dtype)


def joint_autoencoder_forward(params, x):
    """rep = encoder(x); x_hat = decoder(rep); return (rep, x_hat)."""
    batch, in_dim = x.shape
    hidden = params["enc_w1"].shape[1]
    latent = params["enc_w2"].shape[1]
    del hidden  # implied by the weight shapes; kernel never needs it explicitly

    # Batch tile: sublane-aligned, capped at the MXU height so large batches
    # stream through the grid with weights resident.
    tm = min(_round_up(batch, _SUBLANE), _MAX_TM)
    bp = _round_up(batch, tm)

    # Only x is (possibly) padded, and only along batch; never at the demo shape.
    xp = x if bp == batch else jnp.pad(x, ((0, bp - batch), (0, 0)))

    def act_spec(cols):
        # Activation tiles: streamed over the batch grid (last dim = full array
        # dim, so exempt from the 128-lane divisibility rule).
        return pl.BlockSpec((tm, cols), lambda i: (i, 0))

    def resident_spec(arr):
        # Full-array block, constant index_map: loaded once, VMEM-resident.
        return pl.BlockSpec(arr.shape, lambda i: (0,) * arr.ndim)

    weights = [params[n] for n in ("enc_w1", "enc_b1", "enc_w2", "enc_b2",
                                   "dec_w1", "dec_b1", "dec_w2", "dec_b2")]

    rep_p, xhat_p = pl.pallas_call(
        _fused_jae_kernel,
        out_shape=(
            jax.ShapeDtypeStruct((bp, latent), jnp.float32),
            jax.ShapeDtypeStruct((bp, in_dim), jnp.float32),
        ),
        grid=(bp // tm,),
        in_specs=[act_spec(in_dim)] + [resident_spec(w) for w in weights],
        out_specs=(act_spec(latent), act_spec(in_dim)),
        compiler_params=pltpu.CompilerParams(
            dimension_semantics=("parallel",),   # shard batch tiles across TCs on v7x
        ),
    )(xp, *weights)

    if bp != batch:
        rep_p = rep_p[:batch]
        xhat_p = xhat_p[:batch]
    return rep_p, xhat_p


def init_params(key, in_dim, hidden, latent):
    """Deterministic synthetic parameters (arrays only — jit-safe pytree).

    Biases are stored as (1, fan_out) so the kernel consumes them directly
    (no per-call reshape/pad ops).
    """
    keys = jax.random.split(key, 8)

    def lin(kw, kb, fan_in, fan_out):
        scale = 1.0 / jnp.sqrt(jnp.float32(fan_in))
        w = jax.random.uniform(kw, (fan_in, fan_out), jnp.float32, -scale, scale)
        b = jax.random.uniform(kb, (1, fan_out), jnp.float32, -scale, scale)
        return w, b

    enc_w1, enc_b1 = lin(keys[0], keys[1], in_dim, hidden)
    enc_w2, enc_b2 = lin(keys[2], keys[3], hidden, latent)
    dec_w1, dec_b1 = lin(keys[4], keys[5], latent, hidden)
    dec_w2, dec_b2 = lin(keys[6], keys[7], hidden, in_dim)
    return {
        "enc_w1": enc_w1, "enc_b1": enc_b1,
        "enc_w2": enc_w2, "enc_b2": enc_b2,
        "dec_w1": dec_w1, "dec_b1": dec_b1,
        "dec_w2": dec_w2, "dec_b2": dec_b2,
    }


def joint_autoencoder_reference(params, x):
    """Plain-JAX reference for correctness checking."""
    h = jnp.maximum(x @ params["enc_w1"] + params["enc_b1"], 0.0)
    rep = jnp.maximum(h @ params["enc_w2"] + params["enc_b2"], 0.0)
    h2 = jnp.maximum(rep @ params["dec_w1"] + params["dec_b1"], 0.0)
    x_hat = jax.nn.sigmoid(h2 @ params["dec_w2"] + params["dec_b2"])
    return rep, x_hat


if __name__ == "__main__":
    batch, in_dim, hidden, latent = 8, 32, 64, 16

    key = jax.random.PRNGKey(0)
    key_p, key_x = jax.random.split(key)
    params = init_params(key_p, in_dim, hidden, latent)
    x = jax.random.normal(key_x, (batch, in_dim), dtype=jnp.float32)

    rep, x_hat = jax.jit(joint_autoencoder_forward)(params, x)
    jax.block_until_ready((rep, x_hat))

    rep_ref, x_hat_ref = joint_autoencoder_reference(params, x)
    assert rep.shape == (batch, latent) and x_hat.shape == (batch, in_dim)
    assert jnp.allclose(rep, rep_ref, atol=1e-5, rtol=1e-5)
    assert jnp.allclose(x_hat, x_hat_ref, atol=1e-5, rtol=1e-5)

    print("KERNEL_OK")
</pallas_src>

<mosaic_0001>
module attributes {stable_mosaic.version = 11 : i64} {
  func.func @_fused_jae_kernel(%arg0: i32, %arg1: memref<8x32xf32, #tpu.memory_space<vmem>>, %arg2: memref<32x64xf32, #tpu.memory_space<vmem>>, %arg3: memref<1x64xf32, #tpu.memory_space<vmem>>, %arg4: memref<64x16xf32, #tpu.memory_space<vmem>>, %arg5: memref<1x16xf32, #tpu.memory_space<vmem>>, %arg6: memref<16x64xf32, #tpu.memory_space<vmem>>, %arg7: memref<1x64xf32, #tpu.memory_space<vmem>>, %arg8: memref<64x32xf32, #tpu.memory_space<vmem>>, %arg9: memref<1x32xf32, #tpu.memory_space<vmem>>, %arg10: memref<8x16xf32, #tpu.memory_space<vmem>>, %arg11: memref<8x32xf32, #tpu.memory_space<vmem>>) attributes {dimension_semantics = [#tpu.dimension_semantics<parallel>], iteration_bounds = array<i64: 1>, scalar_prefetch = 0 : i64, scratch_operands = 0 : i64, tpu.core_type = #tpu.core_type<tc>, window_params = [{transform_indices = @transform_0, window_bounds = array<i64: 8, 32>}, {pipeline_mode = #tpu.pipeline_mode<synchronous>, transform_indices = @transform_1, window_bounds = array<i64: 32, 64>}, {pipeline_mode = #tpu.pipeline_mode<synchronous>, transform_indices = @transform_2, window_bounds = array<i64: 1, 64>}, {pipeline_mode = #tpu.pipeline_mode<synchronous>, transform_indices = @transform_3, window_bounds = array<i64: 64, 16>}, {pipeline_mode = #tpu.pipeline_mode<synchronous>, transform_indices = @transform_4, window_bounds = array<i64: 1, 16>}, {pipeline_mode = #tpu.pipeline_mode<synchronous>, transform_indices = @transform_5, window_bounds = array<i64: 16, 64>}, {pipeline_mode = #tpu.pipeline_mode<synchronous>, transform_indices = @transform_6, window_bounds = array<i64: 1, 64>}, {pipeline_mode = #tpu.pipeline_mode<synchronous>, transform_indices = @transform_7, window_bounds = array<i64: 64, 32>}, {pipeline_mode = #tpu.pipeline_mode<synchronous>, transform_indices = @transform_8, window_bounds = array<i64: 1, 32>}, {transform_indices = @transform_9, window_bounds = array<i64: 8, 16>}, {transform_indices = @transform_10, window_bounds = array<i64: 8, 32>}]} {
    %c0 = arith.constant 0 : index
    %c0_0 = arith.constant 0 : index
    %0 = vector.load %arg1[%c0, %c0_0] : memref<8x32xf32, #tpu.memory_space<vmem>>, vector<8x32xf32>
    %c0_1 = arith.constant 0 : index
    %c0_2 = arith.constant 0 : index
    %1 = vector.load %arg2[%c0_1, %c0_2] : memref<32x64xf32, #tpu.memory_space<vmem>>, vector<32x64xf32>
    %cst = arith.constant dense<0.000000e+00> : vector<8x64xf32>
    %2 = tpu.matmul %0, %1, %cst {dimension_numbers = #tpu.dot_dimension_numbers<[1], [0], [0], [1], [0, 0, 1, 1], [], []>} : vector<8x32xf32>, vector<32x64xf32>, vector<8x64xf32> -> vector<8x64xf32>
    %c0_3 = arith.constant 0 : index
    %c0_4 = arith.constant 0 : index
    %3 = vector.load %arg3[%c0_3, %c0_4] : memref<1x64xf32, #tpu.memory_space<vmem>>, vector<1x64xf32>
    %4 = vector.broadcast %3 : vector<1x64xf32> to vector<8x64xf32>
    %5 = arith.addf %2, %4 : vector<8x64xf32>
    %cst_5 = arith.constant 0.000000e+00 : f32
    %6 = vector.broadcast %cst_5 : f32 to vector<8x64xf32>
    %7 = arith.maximumf %5, %6 : vector<8x64xf32>
    %c0_6 = arith.constant 0 : index
    %c0_7 = arith.constant 0 : index
    %8 = vector.load %arg4[%c0_6, %c0_7] : memref<64x16xf32, #tpu.memory_space<vmem>>, vector<64x16xf32>
    %cst_8 = arith.constant dense<0.000000e+00> : vector<8x16xf32>
    %9 = tpu.matmul %7, %8, %cst_8 {dimension_numbers = #tpu.dot_dimension_numbers<[1], [0], [0], [1], [0, 0, 1, 1], [], []>} : vector<8x64xf32>, vector<64x16xf32>, vector<8x16xf32> -> vector<8x16xf32>
    %c0_9 = arith.constant 0 : index
    %c0_10 = arith.constant 0 : index
    %10 = vector.load %arg5[%c0_9, %c0_10] : memref<1x16xf32, #tpu.memory_space<vmem>>, vector<1x16xf32>
    %11 = vector.broadcast %10 : vector<1x16xf32> to vector<8x16xf32>
    %12 = arith.addf %9, %11 : vector<8x16xf32>
    %cst_11 = arith.constant 0.000000e+00 : f32
    %13 = vector.broadcast %cst_11 : f32 to vector<8x16xf32>
    %14 = arith.maximumf %12, %13 : vector<8x16xf32>
    %c0_12 = arith.constant 0 : index
    %c0_13 = arith.constant 0 : index
    %15 = vector.load %arg10[%c0_12, %c0_13] : memref<8x16xf32, #tpu.memory_space<vmem>>, vector<8x16xf32>
    tpu.vector_store %arg10[%c0_12, %c0_13], %14 {strides = array<i32>} : memref<8x16xf32, #tpu.memory_space<vmem>>, vector<8x16xf32>,
    %c0_14 = arith.constant 0 : index
    %c0_15 = arith.constant 0 : index
    %16 = vector.load %arg6[%c0_14, %c0_15] : memref<16x64xf32, #tpu.memory_space<vmem>>, vector<16x64xf32>
    %cst_16 = arith.constant dense<0.000000e+00> : vector<8x64xf32>
    %17 = tpu.matmul %14, %16, %cst_16 {dimension_numbers = #tpu.dot_dimension_numbers<[1], [0], [0], [1], [0, 0, 1, 1], [], []>} : vector<8x16xf32>, vector<16x64xf32>, vector<8x64xf32> -> vector<8x64xf32>
    %c0_17 = arith.constant 0 : index
    %c0_18 = arith.constant 0 : index
    %18 = vector.load %arg7[%c0_17, %c0_18] : memref<1x64xf32, #tpu.memory_space<vmem>>, vector<1x64xf32>
    %19 = vector.broadcast %18 : vector<1x64xf32> to vector<8x64xf32>
    %20 = arith.addf %17, %19 : vector<8x64xf32>
    %cst_19 = arith.constant 0.000000e+00 : f32
    %21 = vector.broadcast %cst_19 : f32 to vector<8x64xf32>
    %22 = arith.maximumf %20, %21 : vector<8x64xf32>
    %c0_20 = arith.constant 0 : index
    %c0_21 = arith.constant 0 : index
    %23 = vector.load %arg8[%c0_20, %c0_21] : memref<64x32xf32, #tpu.memory_space<vmem>>, vector<64x32xf32>
    %cst_22 = arith.constant dense<0.000000e+00> : vector<8x32xf32>
    %24 = tpu.matmul %22, %23, %cst_22 {dimension_numbers = #tpu.dot_dimension_numbers<[1], [0], [0], [1], [0, 0, 1, 1], [], []>} : vector<8x64xf32>, vector<64x32xf32>, vector<8x32xf32> -> vector<8x32xf32>
    %c0_23 = arith.constant 0 : index
    %c0_24 = arith.constant 0 : index
    %25 = vector.load %arg9[%c0_23, %c0_24] : memref<1x32xf32, #tpu.memory_space<vmem>>, vector<1x32xf32>
    %26 = vector.broadcast %25 : vector<1x32xf32> to vector<8x32xf32>
    %27 = arith.addf %24, %26 : vector<8x32xf32>
    %28 = arith.negf %27 : vector<8x32xf32>
    %29 = math.exp %28 : vector<8x32xf32>
    %cst_25 = arith.constant 1.000000e+00 : f32
    %30 = vector.broadcast %cst_25 : f32 to vector<8x32xf32>
    %31 = arith.addf %30, %29 : vector<8x32xf32>
    %32 = arith.divf %30, %31 : vector<8x32xf32>
    %c0_26 = arith.constant 0 : index
    %c0_27 = arith.constant 0 : index
    %33 = vector.load %arg11[%c0_26, %c0_27] : memref<8x32xf32, #tpu.memory_space<vmem>>, vector<8x32xf32>
    tpu.vector_store %arg11[%c0_26, %c0_27], %32 {strides = array<i32>} : memref<8x32xf32, #tpu.memory_space<vmem>>, vector<8x32xf32>,
    return
  }
  func.func @transform_0(%arg0: i32) -> (i32, i32) {
    %c0_i32 = arith.constant 0 : i32
    %c0_i32_0 = arith.constant 0 : i32
    return %arg0, %c0_i32 : i32, i32
  }
  func.func @transform_1(%arg0: i32) -> (i32, i32) {
    %c0_i32 = arith.constant 0 : i32
    %c0_i32_0 = arith.constant 0 : i32
    %c0_i32_1 = arith.constant 0 : i32
    return %c0_i32, %c0_i32_0 : i32, i32
  }
  func.func @transform_2(%arg0: i32) -> (i32, i32) {
    %c0_i32 = arith.constant 0 : i32
    %c0_i32_0 = arith.constant 0 : i32
    %c0_i32_1 = arith.constant 0 : i32
    return %c0_i32, %c0_i32_0 : i32, i32
  }
  func.func @transform_3(%arg0: i32) -> (i32, i32) {
    %c0_i32 = arith.constant 0 : i32
    %c0_i32_0 = arith.constant 0 : i32
    %c0_i32_1 = arith.constant 0 : i32
    return %c0_i32, %c0_i32_0 : i32, i32
  }
  func.func @transform_4(%arg0: i32) -> (i32, i32) {
    %c0_i32 = arith.constant 0 : i32
    %c0_i32_0 = arith.constant 0 : i32
    %c0_i32_1 = arith.constant 0 : i32
    return %c0_i32, %c0_i32_0 : i32, i32
  }
  func.func @transform_5(%arg0: i32) -> (i32, i32) {
    %c0_i32 = arith.constant 0 : i32
    %c0_i32_0 = arith.constant 0 : i32
    %c0_i32_1 = arith.constant 0 : i32
    return %c0_i32, %c0_i32_0 : i32, i32
  }
  func.func @transform_6(%arg0: i32) -> (i32, i32) {
    %c0_i32 = arith.constant 0 : i32
    %c0_i32_0 = arith.constant 0 : i32
    %c0_i32_1 = arith.constant 0 : i32
    return %c0_i32, %c0_i32_0 : i32, i32
  }
  func.func @transform_7(%arg0: i32) -> (i32, i32) {
    %c0_i32 = arith.constant 0 : i32
    %c0_i32_0 = arith.constant 0 : i32
    %c0_i32_1 = arith.constant 0 : i32
    return %c0_i32, %c0_i32_0 : i32, i32
  }
  func.func @transform_8(%arg0: i32) -> (i32, i32) {
    %c0_i32 = arith.constant 0 : i32
    %c0_i32_0 = arith.constant 0 : i32
    %c0_i32_1 = arith.constant 0 : i32
    return %c0_i32, %c0_i32_0 : i32, i32
  }
  func.func @transform_9(%arg0: i32) -> (i32, i32) {
    %c0_i32 = arith.constant 0 : i32
    %c0_i32_0 = arith.constant 0 : i32
    return %arg0, %c0_i32 : i32, i32
  }
  func.func @transform_10(%arg0: i32) -> (i32, i32) {
    %c0_i32 = arith.constant 0 : i32
    %c0_i32_0 = arith.constant 0 : i32
    return %arg0, %c0_i32 : i32, i32
  }
}

</mosaic_0001>

<bundles_post_ra>
// kernel: joint_autoencoder_forward.1
= control target key start
LH: loop header
LB: loop body
LE: loop exit
PB: predicated region body
PF: predicated region fallthrough
CT: control target
= control target key end

     0   :  { %16 = vsyncpa [#allocation3], 0  ;;  %v564_v1 = vmov 0.0   ;;  %vm565_vm0 = vmmov 0   ;;  %s744_s0 = inlined_call_operand.vmem [shape: f32[8,32], index: 0, kind: input, shape index: {}]   ;;  %s745_s1 = inlined_call_operand.vmem [shape: f32[32,64], index: 1, kind: input, shape index: {}]   ;;  %s746_s2 = inlined_call_operand.vmem [shape: f32[1,64], index: 2, kind: input, shape index: {}]   ;;  %s747_s3 = inlined_call_operand.vmem [shape: f32[64,16], index: 3, kind: input, shape index: {}]   ;;  %s748_s4 = inlined_call_operand.vmem [shape: f32[1,16], index: 4, kind: input, shape index: {}]   ;;  %s749_s5 = inlined_call_operand.vmem [shape: f32[16,64], index: 5, kind: input, shape index: {}]   ;;  %s750_s6 = inlined_call_operand.vmem [shape: f32[1,64], index: 6, kind: input, shape index: {}]   ;;  %s751_s7 = inlined_call_operand.vmem [shape: f32[64,32], index: 7, kind: input, shape index: {}]   ;;  %s752_s8 = inlined_call_operand.vmem [shape: f32[1,32], index: 8, kind: input, shape index: {}]   ;;  %s753_s9 = inlined_call_operand.hbm [shape: f32[8,16], index: 9, kind: output, shape index: {0}]   ;;  %s754_s10 = inlined_call_operand.hbm [shape: f32[8,32], index: 10, kind: output, shape index: {1}]  }
   0x1   :  { %v40_v0 = vld [vmem:[%s745_s1 + $0x18] sm:$0xff]  ;;  %456 = vmatprep.subr.mxu1 %v564_v1  ;;  %v39_v2 = vld [vmem:[%s745_s1 + $0x10] sm:$0xff]  ;;  %464 = vmatprep.mubr.msk.f32.mxu1 %vm565_vm0, %v564_v1  ;;  %v38_v3 = vld [vmem:[%s745_s1 + $0x8] sm:$0xff] }
   0x2   :  { %457 = vmatpush3.msra.mxu1 %v40_v0  ;;  %486 = vmatprep.subr.mxu0 %v564_v1 }
   0x3   :  { %458 = vmatprep.subr.mxu1 %v564_v1  ;;  %490 = vmatprep.mubr.msk.f32.mxu0 %vm565_vm0, %v564_v1 }
   0x4   :  { %17 = vsyncpa [#allocation5], 0  ;;  %459 = vmatpush3.msra.mxu1 %v39_v2  ;;  %v37_v4 = vld [vmem:[%s745_s1] sm:$0xff]  ;;  %vm48_vm1 = vcmask 261120   ;;  %v130_v6 = vld [vmem:[%s747_s3 + $0x38] sm:$0xff]  ;;  %vm138_vm2 = vcmask 523264  }
   0x5   :  { %460 = vmatprep.subr.mxu1 %v564_v1  ;;  %v36_v5 = vld [vmem:[%s744_s0] sm:$0xff]  ;;  %v129_v7 = vld [vmem:[%s747_s3 + $0x30] sm:$0xff]  ;;  %v128_v8 = vld [vmem:[%s747_s3 + $0x28] sm:$0xff]  ;;  %vm213_vm3 = vcmask 130048   ;;  %s566_s17 = smov [#allocation2]  }
   0x6   :  { %461 = vmatpush3.msra.mxu1 %v38_v3  ;;  %v127_v9 = vld [vmem:[%s747_s3 + $0x20] sm:$0xff]  ;;  %v126_v10 = vld [vmem:[%s747_s3 + $0x18] sm:$0xff]  ;;  %v125_v11 = vld [vmem:[%s747_s3 + $0x10] sm:$0xff]  ;;  %s399_s18 = sshll.u32 %s566_s17, 4  ;;  %s400_s18 = int_to_ptr.vmem [resolvable:$true] %s399_s18 }
   0x7   :  { %462 = vmatprep.subr.mxu1 %v564_v1  ;;  %v124_v12 = vld [vmem:[%s747_s3 + $0x8] sm:$0xff]  ;;  %v123_v13 = vld [vmem:[%s747_s3] sm:$0xff]  ;;  %v305_v26 = vld [vmem:[%s751_s7 + $0x38] sm:$0xff]  ;;  %s520_s19 = scalar_lea.vmem %s400_s18, 128  ;;  %p525_p1 = scmp.lt.s32.totalorder %s400_s18, %s400_s18 }
   0x8   :  { %463 = vmatpush3.msra.mxu1 %v37_v4  ;;  %v421_v14 = vld [vmem:[%s746_s2] ss:$0 sm:$0xff]  ;;  %v216_v19 = vld [vmem:[%s749_s5 + $0x8] sm:$0xff]  ;;  %v304_v27 = vld [vmem:[%s751_s7 + $0x30] sm:$0xff]  ;;  %p521_p0 = scmp.ne.s32.totalorder %s400_s18, %s520_s19  ;;  %p526_p2 = scmp.lt.s32.totalorder %s520_s19, %s520_s19 }
   0x9   :  { %465 = vmatmul.mubr.msk.f32.vlgmr.msra.gmra.mxu1 %vm48_vm1, %v36_v5  ;;  %467 = vmatprep.subr.mxu1 %v564_v1  ;;  %v215_v20 = vld [vmem:[%s749_s5] sm:$0xff]  ;;  %v303_v28 = vld [vmem:[%s751_s7 + $0x28] sm:$0xff]  ;;  %v301_v30 = vld [vmem:[%s751_s7 + $0x18] sm:$0xff] }
   0xa   :  { %468 = vmatpush3.msra.mxu1 %v130_v6  ;;  %483 = vmatprep.mubr.msk.f32.mxu1 %vm565_vm0, %v564_v1  ;;  %v423_v21 = vld [vmem:[%s748_s4] ss:$0 sm:$0xff]  ;;  %v300_v31 = vld [vmem:[%s751_s7 + $0x10] sm:$0xff]  ;;  %v299_v32 = vld [vmem:[%s751_s7 + $0x8] sm:$0xff]  ;;  %p527_p3 = por %p526_p2, %p525_p1 }
   0xb   :  { %469 = vmatprep.subr.mxu1 %v564_v1  ;;  %487 = vmatpush3.msra.mxu0 %v216_v19  ;;  %v302_v29 = vld [vmem:[%s751_s7 + $0x20] sm:$0xff] }
   0xc   :  { %470 = vmatpush3.msra.mxu1 %v129_v7  ;;  %488 = vmatprep.subr.mxu0 %v564_v1  ;;  %v298_v33 = vld [vmem:[%s751_s7] sm:$0xff]  ;;  %p528_p4 = pnand %p527_p3, %p521_p0 }
   0xd   :  { %471 = vmatprep.subr.mxu1 %v564_v1  ;;  %489 = vmatpush3.msra.mxu0 %v215_v20  ;;  %v425_v34 = vld [vmem:[%s750_s6] ss:$0 sm:$0xff] }
   0xe   :  { %472 = vmatpush3.msra.mxu1 %v128_v8  ;;  %493 = vmatprep.subr.mxu0 %v564_v1 }
   0xf   :  { %473 = vmatprep.subr.mxu1 %v564_v1 }
  0x10   :  { %474 = vmatpush3.msra.mxu1 %v127_v9 }
  0x11   :  { %475 = vmatprep.subr.mxu1 %v564_v1 }
  0x12   :  { %476 = vmatpush3.msra.mxu1 %v126_v10 }
  0x13   :  { %477 = vmatprep.subr.mxu1 %v564_v1 }
  0x14   :  { %478 = vmatpush3.msra.mxu1 %v125_v11 }
  0x15   :  { %479 = vmatprep.subr.mxu1 %v564_v1 }
  0x16   :  { %480 = vmatpush3.msra.mxu1 %v124_v12 }
  0x17   :  { %481 = vmatprep.subr.mxu1 %v564_v1 }
  0x18   :  { %482 = vmatpush3.msra.mxu1 %v123_v13 }
  0xc9   :  { %v118_v15 = vpop.f32.mrf.mxu1 }
  0xca   :  { %v119_v16 = vadd.f32 %v421_v14, %v118_v15 }
  0xcb   :  { %v466_v17 = vpop.f32.mrf.mxu1 }
  0xcc   :  { %v122_v18 = vmax.f32 %v119_v16, 0.0 }
  0xce   :  { %484 = vmatmul.mubr.msk.f32.vlgmr.msra.gmra.mxu1 %vm138_vm2, %v122_v18 }
 0x18e   :  { %v208_v22 = vpop.f32.mrf.mxu1 }
 0x18f   :  { %v209_v23 = vadd.f32 %v423_v21, %v208_v22 }
 0x190   :  { %v485_v24 = vpop.f32.mrf.mxu1 }
 0x191   :  { %v212_v25 = vmax.f32 %v209_v23, 0.0 }
 0x193   :  { %491 = vmatmul.mubr.msk.f32.vlgmr.msra.gmra.mxu0 %vm213_vm3, %v212_v25  ;;  %214 = vst.msk [vmem:[#allocation2] sm:$0xff] %vm213_vm3, %v212_v25 }
 0x194   :  { %494 = vmatpush3.msra.mxu0 %v305_v26  ;;  %509 = vmatprep.mubr.msk.f32.mxu0 %vm565_vm0, %v564_v1 }
 0x195   :  { %495 = vmatprep.subr.mxu0 %v564_v1 }
 0x196   :  { %496 = vmatpush3.msra.mxu0 %v304_v27 }
 0x197   :  { %497 = vmatprep.subr.mxu0 %v564_v1 }
 0x198   :  { %498 = vmatpush3.msra.mxu0 %v303_v28 }
 0x199   :  { %499 = vmatprep.subr.mxu0 %v564_v1 }
 0x19a   :  { %500 = vmatpush3.msra.mxu0 %v302_v29 }
 0x19b   :  { %501 = vmatprep.subr.mxu0 %v564_v1 }
 0x19c   :  { %502 = vmatpush3.msra.mxu0 %v301_v30 }
 0x19d   :  { %503 = vmatprep.subr.mxu0 %v564_v1 }
 0x19e   :  { %504 = vmatpush3.msra.mxu0 %v300_v31 }
 0x19f   :  { %505 = vmatprep.subr.mxu0 %v564_v1 }
 0x1a0   :  { %506 = vmatpush3.msra.mxu0 %v299_v32 }
 0x1a1   :  { %507 = vmatprep.subr.mxu0 %v564_v1 }
 0x1a2   :  { %508 = vmatpush3.msra.mxu0 %v298_v33 }
 0x253   :  { %v293_v35 = vpop.f32.mrf.mxu0 }
 0x254   :  { %v294_v36 = vadd.f32 %v425_v34, %v293_v35 }
 0x255   :  { %v492_v37 = vpop.f32.mrf.mxu0 }
 0x256   :  { %v297_v38 = vmax.f32 %v294_v36, 0.0 }
 0x258   :  { %510 = vmatmul.mubr.msk.f32.vlgmr.msra.gmra.mxu0 %vm138_vm2, %v297_v38 }
 0x259   :  { %531 = shalt.err (!%p528_p4)
}
 0x25a   :  { %402 = dma.vmem_to_hbm [thread:$0]  %s400_s18, 128, %s753_s9, [#allocation3]   ;;  %v427_v39 = vld [vmem:[%s752_s8] ss:$0 sm:$0xff] }
 0x25b   :  { %s567_s21 = smov [#allocation4]  }
 0x25c   :  { %s409_s2 = sshll.u32 %s567_s21, 4  ;;  %s410_s2 = int_to_ptr.vmem [resolvable:$true] %s409_s2 }
 0x25d   :  { %s540_s22 = scalar_lea.vmem %s410_s2, 128  ;;  %p545_p6 = scmp.lt.s32.totalorder %s410_s2, %s410_s2 }
 0x25e   :  { %p541_p5 = scmp.ne.s32.totalorder %s410_s2, %s540_s22  ;;  %p546_p7 = scmp.lt.s32.totalorder %s540_s22, %s540_s22 }
 0x260   :  { %p547_p8 = por %p546_p7, %p545_p6 }
 0x262   :  { %p548_p9 = pnand %p547_p8, %p541_p5 }
 0x318   :  { %v382_v40 = vpop.f32.mrf.mxu0 }
 0x319   :  { %v383_v41 = vadd.f32 %v427_v39, %v382_v40 }
 0x31a   :  { %v511_v42 = vpop.f32.mrf.mxu0 }
 0x31b   :  { %v429_v43 = vmul.f32 -1.442695, %v383_v41 }
 0x31d   :  { %516 = vpow2.f32 %v429_v43 }
 0x32a   :  { %v517_v44 = vpop.eup %516 }
 0x32b   :  { %v389_v45 = vadd.f32 1.0, %v517_v44 }
 0x32d   :  { %518 = vrcp.f32 %v389_v45 }
 0x33a   :  { %v519_v46 = vpop.eup %518 }
 0x33b   :  { %392 = vst.msk [vmem:[#allocation4] sm:$0xff] %vm48_vm1, %v519_v46 }
 0x33c   :  { %551 = shalt.err (!%p548_p9)
}
 0x33d   :  { %412 = dma.vmem_to_hbm [thread:$0]  %s410_s2, 128, %s754_s10, [#allocation5]  }
 0x33e   :  { %560 = dma.done.wait [#allocation3], 128  }
 0x33f   :  { %561 = vsyncadd [#allocation3], 4294967168 }
 0x340   :  { %562 = dma.done.wait [#allocation5], 128  }
 0x341   :  { %563 = vsyncadd [#allocation5], 4294967168 }
 0x342   :  { %419 = vsyncpa [#allocation3], 1 }
 0x343   :  { %420 = vsyncpa [#allocation5], 1 }

</bundles_post_ra>
